<compile_context>
chip_gen: v7x
topology: tpu7x:2x2x1
jax: 0.10.0
libtpu: 0.0.40
codegen_flags: <defaults>
</compile_context>

<pallas_src>
import functools

import numpy as np

import jax
import jax.numpy as jnp
from jax.experimental import pallas as pl
from jax.experimental.pallas import tpu as pltpu


def _compiler_params(**kw):
    cp = getattr(pltpu, "CompilerParams", None)
    if cp is None:                       # older jax releases
        cp = pltpu.TPUCompilerParams
    return cp(**kw)


# ----------------------------- fused Pallas kernel ---------------------------

def _fused_glyph_kernel(bitmap_ref, label_ref, pos_ref,
                        wexp_ref, bexp_ref, wproj_ref, bproj_ref,
                        lng_ref, lnb_ref, wcls_ref, bcls_ref,
                        emb_ref, nll_ref,
                        feat_sc, m_sc, l_sc, tgt_sc):
    """Grid = (token_blocks, vocab_tiles); vocab is the innermost 'arbitrary' axis."""
    v = pl.program_id(1)
    num_v = pl.num_programs(1)
    c_conv = wproj_ref.shape[0]
    tile_v = wcls_ref.shape[1]

    # ------------- stage 1+2 (run once per token block, at first vocab tile) --
    @pl.when(v == 0)
    def _conv_pool_project_layernorm():
        # glyph CNN: valid KxK conv + bias + relu expressed as one matmul
        # against the pre-expanded weight (64 -> P_pad*C columns, col = p*C + c).
        x = bitmap_ref[...].astype(jnp.float32)                     # (tn, 64)
        y = jnp.dot(x, wexp_ref[...], preferred_element_type=jnp.float32)
        y = jnp.maximum(y + bexp_ref[...], 0.0)                     # (tn, P_pad*C)

        # global max-pool over spatial positions without reshapes:
        # 128-wide lane chunks hold (128 // C) positions each -> chunk maxima,
        # then fold 128 -> C by halving lane slices.
        pc = y.shape[1]
        z = y[:, :128]
        for k in range(1, pc // 128):
            z = jnp.maximum(z, y[:, k * 128:(k + 1) * 128])
        width = 128
        while width > c_conv:
            width //= 2
            z = jnp.maximum(z[:, :width], z[:, width:])
        feat_sc[...] = z                                            # (tn, C)

        # projection to output_size + position embedding + BertLayerNorm
        h = jnp.dot(z, wproj_ref[...], preferred_element_type=jnp.float32)
        h = h + bproj_ref[...] + pos_ref[...].astype(jnp.float32)
        mu = jnp.mean(h, axis=-1, keepdims=True)
        var = jnp.mean(h * h, axis=-1, keepdims=True) - mu * mu     # one pass
        hn = (h - mu) * jax.lax.rsqrt(var + 1e-12)                  # eps = 1e-12
        emb_ref[...] = (hn * lng_ref[...] + lnb_ref[...]).astype(emb_ref.dtype)
        # nn.Dropout: identity at inference time.

        # init online log-sum-exp state for the classification loss
        m_sc[...] = jnp.full(m_sc.shape, -jnp.inf, m_sc.dtype)
        l_sc[...] = jnp.zeros(l_sc.shape, l_sc.dtype)
        tgt_sc[...] = jnp.zeros(tgt_sc.shape, tgt_sc.dtype)

    # ------------- stage 3: glyph classifier, online LSE over vocab tiles -----
    feat = feat_sc[...]                                             # (tn, C)
    logits = jnp.dot(feat, wcls_ref[...], preferred_element_type=jnp.float32)
    logits = logits + bcls_ref[...]                                 # (tn, tile_v)

    m_prev = m_sc[...]
    m_new = jnp.maximum(m_prev, jnp.max(logits, axis=-1, keepdims=True))
    l_sc[...] = (jnp.exp(m_prev - m_new) * l_sc[...]
                 + jnp.sum(jnp.exp(logits - m_new), axis=-1, keepdims=True))
    m_sc[...] = m_new

    # pick out the target logit when the label falls inside this vocab tile
    col = jax.lax.broadcasted_iota(jnp.int32, logits.shape, 1) + v * tile_v
    hit = (col == label_ref[...]).astype(jnp.float32)
    tgt_sc[...] = tgt_sc[...] + jnp.sum(hit * logits, axis=-1, keepdims=True)

    @pl.when(v == num_v - 1)
    def _finalize_loss():
        nll_ref[...] = m_sc[...] + jnp.log(l_sc[...]) - tgt_sc[...]


# ----------------------------- conv-weight expansion -------------------------

def _expand_conv_params(conv_w, conv_b, hw, k):
    """Rewrite the valid KxK conv (+bias) as one (HW*HW, P_pad*C) dense matmul.

    Column order is p*C + c so every 128-lane chunk holds 128//C positions.
    Padded positions get weight 0 and bias -1e30 (-> 0 after relu), so they can
    never win the max-pool (real relu outputs are >= 0).
    """
    c = conv_w.shape[1]
    oh = hw - k + 1
    p_real = oh * oh
    pos_per_chunk = 128 // c
    p_pad = -(-p_real // pos_per_chunk) * pos_per_chunk
    m = np.zeros((hw * hw, p_pad, k * k), np.float32)
    for p in range(p_real):
        po, pw = divmod(p, oh)
        for ki in range(k):
            for kj in range(k):
                m[(po + ki) * hw + (pw + kj), p, ki * k + kj] = 1.0
    w_exp = jnp.einsum("fpk,kc->fpc", jnp.asarray(m), conv_w)
    w_exp = w_exp.reshape(hw * hw, p_pad * c)
    pad_mask = jnp.asarray((np.arange(p_pad) < p_real)[:, None])
    b_exp = jnp.where(pad_mask, conv_b[None, :], jnp.float32(-1e30))
    b_exp = b_exp.reshape(1, p_pad * c)
    return w_exp, b_exp


# ----------------------------- params & forward ------------------------------

def init_params(key, *, vocab, max_pos, hidden, glyph_hw, k_conv, c_conv):
    ks = jax.random.split(key, 6)
    p = {}
    # nn.Embedding(max_position_embeddings, output_size)
    p["pos_table"] = 0.02 * jax.random.normal(ks[0], (max_pos, hidden), jnp.float32)
    # TODO(synk): real glyphs come from rendered BertTokenizer tokens; synthetic
    # {0,1} bitmaps stored bf16 (exact) stand in and halve HBM traffic.
    p["glyph_table"] = (jax.random.uniform(ks[1], (vocab, glyph_hw, glyph_hw))
                        > 0.5).astype(jnp.bfloat16)
    # glyph CNN weights (PyTorch (Cout,1,KH,KW) flattened to (KH*KW, Cout))
    p["conv_w"] = 0.1 * jax.random.normal(ks[2], (k_conv * k_conv, c_conv), jnp.float32)
    p["conv_b"] = jnp.zeros((c_conv,), jnp.float32)
    p["proj_w"] = 0.02 * jax.random.normal(ks[3], (c_conv, hidden), jnp.float32)
    p["proj_b"] = jnp.zeros((1, hidden), jnp.float32)
    p["cls_w"] = 0.02 * jax.random.normal(ks[4], (c_conv, vocab), jnp.float32)
    p["cls_b"] = jnp.zeros((1, vocab), jnp.float32)
    # BertLayerNorm(output_size, eps=1e-12)
    p["ln_g"] = jnp.ones((1, hidden), jnp.float32)
    p["ln_b"] = jnp.zeros((1, hidden), jnp.float32)
    return p


def glyph_position_embedder_forward(params, input_ids, *, glyph_hw, k_conv,
                                    tile_n=None, tile_v=128):
    b, s = input_ids.shape
    n = b * s
    hidden = params["pos_table"].shape[1]
    vocab = params["cls_w"].shape[1]
    c_conv = params["conv_w"].shape[1]
    hw2 = glyph_hw * glyph_hw

    if tile_n is None:
        tile_n = min(n, 512)
    # NOTE(v7x): keep 2*(bitmaps + pos + emb) blocks + weights under the scoped
    # VMEM limit (64 MiB physical on v7x) when raising tile_n / tile_v.
    assert n % tile_n == 0 and tile_n % 8 == 0
    assert (s % tile_n == 0) or (tile_n % s == 0)
    assert vocab % tile_v == 0 and tile_v % 128 == 0
    assert 128 % c_conv == 0 and (c_conv & (c_conv - 1)) == 0

    # conv expressed as a single expanded matmul (tiny, computed once per call)
    w_exp, b_exp = _expand_conv_params(params["conv_w"], params["conv_b"],
                                       glyph_hw, k_conv)
    assert w_exp.shape[1] % 128 == 0

    # glyph bitmap gather (XLA): 64 bf16 values per token, no im2col blow-up
    ids_flat = input_ids.reshape(-1).astype(jnp.int32)
    bitmaps = jnp.take(params["glyph_table"].reshape(vocab, hw2), ids_flat, axis=0)
    labels = ids_flat.reshape(n, 1)

    # position table passed as (S, H) and reused across the batch by index_map
    if tile_n <= s:
        pos_in = params["pos_table"][:s]
        n_pos_blocks = s // tile_n
        pos_spec = pl.BlockSpec((tile_n, hidden), lambda i, v: (i % n_pos_blocks, 0))
    else:
        pos_in = jnp.tile(params["pos_table"][:s], (tile_n // s, 1))
        pos_spec = pl.BlockSpec((tile_n, hidden), lambda i, v: (0, 0))

    def full_spec(arr):
        return pl.BlockSpec(arr.shape, lambda i, v: (0, 0))

    grid = (n // tile_n, vocab // tile_v)

    emb, nll = pl.pallas_call(
        _fused_glyph_kernel,
        out_shape=[jax.ShapeDtypeStruct((n, hidden), jnp.float32),
                   jax.ShapeDtypeStruct((n, 1), jnp.float32)],
        grid_spec=pltpu.PrefetchScalarGridSpec(
            num_scalar_prefetch=0,
            grid=grid,
            in_specs=[
                pl.BlockSpec((tile_n, hw2), lambda i, v: (i, 0)),     # bitmaps
                pl.BlockSpec((tile_n, 1), lambda i, v: (i, 0)),       # labels
                pos_spec,                                             # positions
                full_spec(w_exp), full_spec(b_exp),                   # conv (expanded)
                full_spec(params["proj_w"]), full_spec(params["proj_b"]),
                full_spec(params["ln_g"]), full_spec(params["ln_b"]),
                pl.BlockSpec((c_conv, tile_v), lambda i, v: (0, v)),  # cls_w tile
                pl.BlockSpec((1, tile_v), lambda i, v: (0, v)),       # cls_b tile
            ],
            out_specs=[
                pl.BlockSpec((tile_n, hidden), lambda i, v: (i, 0)),  # embeddings
                pl.BlockSpec((tile_n, 1), lambda i, v: (i, 0)),       # per-token NLL
            ],
            scratch_shapes=[
                pltpu.VMEM((tile_n, c_conv), jnp.float32),  # pooled glyph feature
                pltpu.VMEM((tile_n, 1), jnp.float32),       # running max (LSE)
                pltpu.VMEM((tile_n, 1), jnp.float32),       # running sum (LSE)
                pltpu.VMEM((tile_n, 1), jnp.float32),       # target logit
            ]),
        compiler_params=_compiler_params(
            dimension_semantics=("parallel", "arbitrary")),
    )(bitmaps, labels, pos_in, w_exp, b_exp,
      params["proj_w"], params["proj_b"], params["ln_g"], params["ln_b"],
      params["cls_w"], params["cls_b"])

    # mean CrossEntropyLoss over all tokens; reduced outside the kernel so the
    # token grid axis stays safely 'parallel' (megacore on v7x).
    loss = jnp.mean(nll)
    return emb.reshape(b, s, hidden), loss


# ----------------------------- pure-JAX reference ----------------------------

def reference_forward(params, input_ids, *, glyph_hw, k_conv):
    b, s = input_ids.shape
    ids = input_ids.reshape(-1)
    imgs = jnp.take(params["glyph_table"].astype(jnp.float32), ids, axis=0)
    oh = glyph_hw - k_conv + 1
    cols = [imgs[:, i:i + oh, j:j + oh] for i in range(k_conv) for j in range(k_conv)]
    patches = jnp.stack(cols, axis=-1).reshape(ids.shape[0], oh * oh, k_conv * k_conv)
    y = jnp.einsum("npk,kc->npc", patches, params["conv_w"]) + params["conv_b"]
    feat = jnp.max(jax.nn.relu(y), axis=1)
    pos = params["pos_table"][jnp.tile(jnp.arange(s), b)]
    h = feat @ params["proj_w"] + params["proj_b"] + pos
    mu = h.mean(-1, keepdims=True)
    var = ((h - mu) ** 2).mean(-1, keepdims=True)
    emb = (h - mu) / jnp.sqrt(var + 1e-12) * params["ln_g"] + params["ln_b"]
    logits = feat @ params["cls_w"] + params["cls_b"]
    logp = jax.nn.log_softmax(logits, axis=-1)
    nll = -jnp.take_along_axis(logp, ids[:, None], axis=1)
    return emb.reshape(b, s, -1), nll.mean()


# ----------------------------- main -------------------------------------------

if __name__ == "__main__":
    B, S = 2, 16
    HIDDEN = 128       # config.output_size (multiple of 128 -> lane-dense stores)
    MAX_POS = 32       # config.max_position_embeddings
    VOCAB = 256        # len(idx2tokens); multiple of the 128-wide vocab tile
    GLYPH_HW = 8       # synthetic glyph bitmap size
    K_CONV = 3
    C_CONV = 16        # glyph conv channels (power of 2 dividing 128)

    key = jax.random.PRNGKey(0)
    k_param, k_ids = jax.random.split(key)
    params = init_params(k_param, vocab=VOCAB, max_pos=MAX_POS, hidden=HIDDEN,
                         glyph_hw=GLYPH_HW, k_conv=K_CONV, c_conv=C_CONV)
    input_ids = jax.random.randint(k_ids, (B, S), 0, VOCAB, dtype=jnp.int32)

    fwd = jax.jit(functools.partial(glyph_position_embedder_forward,
                                    glyph_hw=GLYPH_HW, k_conv=K_CONV,
                                    tile_n=16, tile_v=128))
    embeddings, glyph_cls_loss_val = fwd(params, input_ids)
    jax.block_until_ready((embeddings, glyph_cls_loss_val))

    assert embeddings.shape == (B, S, HIDDEN)
    assert embeddings.dtype == jnp.float32
    assert glyph_cls_loss_val.shape == ()

    ref_emb, ref_loss = reference_forward(params, input_ids,
                                          glyph_hw=GLYPH_HW, k_conv=K_CONV)
    assert jnp.allclose(embeddings, ref_emb, atol=2e-2, rtol=2e-2), \
        float(jnp.max(jnp.abs(embeddings - ref_emb)))
    assert jnp.allclose(glyph_cls_loss_val, ref_loss, atol=2e-2, rtol=2e-2), \
        (float(glyph_cls_loss_val), float(ref_loss))

    print("KERNEL_OK")
</pallas_src>

<mosaic_0001>
module attributes {stable_mosaic.version = 11 : i64} {
  func.func @_fused_glyph_kernel(%arg0: i32, %arg1: i32, %arg2: memref<16x64xbf16, #tpu.memory_space<vmem>>, %arg3: memref<16x1xi32, #tpu.memory_space<vmem>>, %arg4: memref<16x128xf32, #tpu.memory_space<vmem>>, %arg5: memref<64x640xf32, #tpu.memory_space<vmem>>, %arg6: memref<1x640xf32, #tpu.memory_space<vmem>>, %arg7: memref<16x128xf32, #tpu.memory_space<vmem>>, %arg8: memref<1x128xf32, #tpu.memory_space<vmem>>, %arg9: memref<1x128xf32, #tpu.memory_space<vmem>>, %arg10: memref<1x128xf32, #tpu.memory_space<vmem>>, %arg11: memref<16x128xf32, #tpu.memory_space<vmem>>, %arg12: memref<1x128xf32, #tpu.memory_space<vmem>>, %arg13: memref<16x128xf32, #tpu.memory_space<vmem>>, %arg14: memref<16x1xf32, #tpu.memory_space<vmem>>, %arg15: memref<16x16xf32, #tpu.memory_space<vmem>>, %arg16: memref<16x1xf32, #tpu.memory_space<vmem>>, %arg17: memref<16x1xf32, #tpu.memory_space<vmem>>, %arg18: memref<16x1xf32, #tpu.memory_space<vmem>>) attributes {dimension_semantics = [#tpu.dimension_semantics<parallel>, #tpu.dimension_semantics<arbitrary>], iteration_bounds = array<i64: 2, 2>, scalar_prefetch = 0 : i64, scratch_operands = 4 : i64, tpu.core_type = #tpu.core_type<tc>, window_params = [{transform_indices = @transform_0, window_bounds = array<i64: 16, 64>}, {transform_indices = @transform_1, window_bounds = array<i64: 16, 1>}, {transform_indices = @transform_2, window_bounds = array<i64: 16, 128>}, {pipeline_mode = #tpu.pipeline_mode<synchronous>, transform_indices = @transform_3, window_bounds = array<i64: 64, 640>}, {pipeline_mode = #tpu.pipeline_mode<synchronous>, transform_indices = @transform_4, window_bounds = array<i64: 1, 640>}, {pipeline_mode = #tpu.pipeline_mode<synchronous>, transform_indices = @transform_5, window_bounds = array<i64: 16, 128>}, {pipeline_mode = #tpu.pipeline_mode<synchronous>, transform_indices = @transform_6, window_bounds = array<i64: 1, 128>}, {pipeline_mode = #tpu.pipeline_mode<synchronous>, transform_indices = @transform_7, window_bounds = array<i64: 1, 128>}, {pipeline_mode = #tpu.pipeline_mode<synchronous>, transform_indices = @transform_8, window_bounds = array<i64: 1, 128>}, {transform_indices = @transform_9, window_bounds = array<i64: 16, 128>}, {transform_indices = @transform_10, window_bounds = array<i64: 1, 128>}, {transform_indices = @transform_11, window_bounds = array<i64: 16, 128>}, {transform_indices = @transform_12, window_bounds = array<i64: 16, 1>}]} {
    %c0_i32 = arith.constant 0 : i32
    %0 = arith.cmpi eq, %arg1, %c0_i32 : i32
    %1 = arith.extui %0 : i1 to i32
    %c0_i32_0 = arith.constant 0 : i32
    %2 = arith.cmpi ne, %1, %c0_i32_0 : i32
    scf.if %2 {
      %c0_24 = arith.constant 0 : index
      %c0_25 = arith.constant 0 : index
      %43 = vector.load %arg2[%c0_24, %c0_25] : memref<16x64xbf16, #tpu.memory_space<vmem>>, vector<16x64xbf16>
      %44 = arith.extf %43 : vector<16x64xbf16> to vector<16x64xf32>
      %c0_26 = arith.constant 0 : index
      %c0_27 = arith.constant 0 : index
      %45 = vector.load %arg5[%c0_26, %c0_27] : memref<64x640xf32, #tpu.memory_space<vmem>>, vector<64x640xf32>
      %cst_28 = arith.constant dense<0.000000e+00> : vector<16x640xf32>
      %46 = tpu.matmul %44, %45, %cst_28 {dimension_numbers = #tpu.dot_dimension_numbers<[1], [0], [0], [1], [0, 0, 1, 1], [], []>} : vector<16x64xf32>, vector<64x640xf32>, vector<16x640xf32> -> vector<16x640xf32>
      %c0_29 = arith.constant 0 : index
      %c0_30 = arith.constant 0 : index
      %47 = vector.load %arg6[%c0_29, %c0_30] : memref<1x640xf32, #tpu.memory_space<vmem>>, vector<1x640xf32>
      %48 = vector.broadcast %47 : vector<1x640xf32> to vector<16x640xf32>
      %49 = arith.addf %46, %48 : vector<16x640xf32>
      %cst_31 = arith.constant 0.000000e+00 : f32
      %50 = vector.broadcast %cst_31 : f32 to vector<16x640xf32>
      %51 = arith.maximumf %49, %50 : vector<16x640xf32>
      %52 = vector.extract_strided_slice %51 {offsets = [0, 0], sizes = [16, 128], strides = [1, 1]} : vector<16x640xf32> to vector<16x128xf32>
      %53 = vector.extract_strided_slice %51 {offsets = [0, 128], sizes = [16, 128], strides = [1, 1]} : vector<16x640xf32> to vector<16x128xf32>
      %54 = arith.maximumf %52, %53 : vector<16x128xf32>
      %55 = vector.extract_strided_slice %51 {offsets = [0, 256], sizes = [16, 128], strides = [1, 1]} : vector<16x640xf32> to vector<16x128xf32>
      %56 = arith.maximumf %54, %55 : vector<16x128xf32>
      %57 = vector.extract_strided_slice %51 {offsets = [0, 384], sizes = [16, 128], strides = [1, 1]} : vector<16x640xf32> to vector<16x128xf32>
      %58 = arith.maximumf %56, %57 : vector<16x128xf32>
      %59 = vector.extract_strided_slice %51 {offsets = [0, 512], sizes = [16, 128], strides = [1, 1]} : vector<16x640xf32> to vector<16x128xf32>
      %60 = arith.maximumf %58, %59 : vector<16x128xf32>
      %61 = vector.extract_strided_slice %60 {offsets = [0, 0], sizes = [16, 64], strides = [1, 1]} : vector<16x128xf32> to vector<16x64xf32>
      %62 = vector.extract_strided_slice %60 {offsets = [0, 64], sizes = [16, 64], strides = [1, 1]} : vector<16x128xf32> to vector<16x64xf32>
      %63 = arith.maximumf %61, %62 : vector<16x64xf32>
      %64 = vector.extract_strided_slice %63 {offsets = [0, 0], sizes = [16, 32], strides = [1, 1]} : vector<16x64xf32> to vector<16x32xf32>
      %65 = vector.extract_strided_slice %63 {offsets = [0, 32], sizes = [16, 32], strides = [1, 1]} : vector<16x64xf32> to vector<16x32xf32>
      %66 = arith.maximumf %64, %65 : vector<16x32xf32>
      %67 = vector.extract_strided_slice %66 {offsets = [0, 0], sizes = [16, 16], strides = [1, 1]} : vector<16x32xf32> to vector<16x16xf32>
      %68 = vector.extract_strided_slice %66 {offsets = [0, 16], sizes = [16, 16], strides = [1, 1]} : vector<16x32xf32> to vector<16x16xf32>
      %69 = arith.maximumf %67, %68 : vector<16x16xf32>
      %c0_32 = arith.constant 0 : index
      %c0_33 = arith.constant 0 : index
      %70 = vector.load %arg15[%c0_32, %c0_33] : memref<16x16xf32, #tpu.memory_space<vmem>>, vector<16x16xf32>
      tpu.vector_store %arg15[%c0_32, %c0_33], %69 {strides = array<i32>} : memref<16x16xf32, #tpu.memory_space<vmem>>, vector<16x16xf32>,
      %c0_34 = arith.constant 0 : index
      %c0_35 = arith.constant 0 : index
      %71 = vector.load %arg7[%c0_34, %c0_35] : memref<16x128xf32, #tpu.memory_space<vmem>>, vector<16x128xf32>
      %cst_36 = arith.constant dense<0.000000e+00> : vector<16x128xf32>
      %72 = tpu.matmul %69, %71, %cst_36 {dimension_numbers = #tpu.dot_dimension_numbers<[1], [0], [0], [1], [0, 0, 1, 1], [], []>} : vector<16x16xf32>, vector<16x128xf32>, vector<16x128xf32> -> vector<16x128xf32>
      %c0_37 = arith.constant 0 : index
      %c0_38 = arith.constant 0 : index
      %73 = vector.load %arg8[%c0_37, %c0_38] : memref<1x128xf32, #tpu.memory_space<vmem>>, vector<1x128xf32>
      %74 = vector.broadcast %73 : vector<1x128xf32> to vector<16x128xf32>
      %75 = arith.addf %72, %74 : vector<16x128xf32>
      %c0_39 = arith.constant 0 : index
      %c0_40 = arith.constant 0 : index
      %76 = vector.load %arg4[%c0_39, %c0_40] : memref<16x128xf32, #tpu.memory_space<vmem>>, vector<16x128xf32>
      %77 = arith.addf %75, %76 : vector<16x128xf32>
      %cst_41 = arith.constant dense<0.000000e+00> : vector<16xf32>
      %78 = vector.multi_reduction <add>, %77, %cst_41 [1] : vector<16x128xf32> to vector<16xf32>
      %79 = vector.shape_cast %78 : vector<16xf32> to vector<16x1xf32>
      %cst_42 = arith.constant 1.280000e+02 : f32
      %80 = vector.broadcast %cst_42 : f32 to vector<16x1xf32>
      %81 = arith.divf %79, %80 : vector<16x1xf32>
      %82 = arith.mulf %77, %77 : vector<16x128xf32>
      %cst_43 = arith.constant dense<0.000000e+00> : vector<16xf32>
      %83 = vector.multi_reduction <add>, %82, %cst_43 [1] : vector<16x128xf32> to vector<16xf32>
      %84 = vector.shape_cast %83 : vector<16xf32> to vector<16x1xf32>
      %cst_44 = arith.constant 1.280000e+02 : f32
      %85 = vector.broadcast %cst_44 : f32 to vector<16x1xf32>
      %86 = arith.divf %84, %85 : vector<16x1xf32>
      %87 = arith.mulf %81, %81 : vector<16x1xf32>
      %88 = arith.subf %86, %87 : vector<16x1xf32>
      %89 = vector.broadcast %81 : vector<16x1xf32> to vector<16x128xf32>
      %90 = arith.subf %77, %89 : vector<16x128xf32>
      %cst_45 = arith.constant 9.99999996E-13 : f32
      %91 = vector.broadcast %cst_45 : f32 to vector<16x1xf32>
      %92 = arith.addf %88, %91 : vector<16x1xf32>
      %93 = math.rsqrt %92 : vector<16x1xf32>
      %94 = vector.broadcast %93 : vector<16x1xf32> to vector<16x128xf32>
      %95 = arith.mulf %90, %94 : vector<16x128xf32>
      %c0_46 = arith.constant 0 : index
      %c0_47 = arith.constant 0 : index
      %96 = vector.load %arg9[%c0_46, %c0_47] : memref<1x128xf32, #tpu.memory_space<vmem>>, vector<1x128xf32>
      %97 = vector.broadcast %96 : vector<1x128xf32> to vector<16x128xf32>
      %98 = arith.mulf %95, %97 : vector<16x128xf32>
      %c0_48 = arith.constant 0 : index
      %c0_49 = arith.constant 0 : index
      %99 = vector.load %arg10[%c0_48, %c0_49] : memref<1x128xf32, #tpu.memory_space<vmem>>, vector<1x128xf32>
      %100 = vector.broadcast %99 : vector<1x128xf32> to vector<16x128xf32>
      %101 = arith.addf %98, %100 : vector<16x128xf32>
      %c0_50 = arith.constant 0 : index
      %c0_51 = arith.constant 0 : index
      %102 = vector.load %arg13[%c0_50, %c0_51] : memref<16x128xf32, #tpu.memory_space<vmem>>, vector<16x128xf32>
      tpu.vector_store %arg13[%c0_50, %c0_51], %101 {strides = array<i32>} : memref<16x128xf32, #tpu.memory_space<vmem>>, vector<16x128xf32>,
      %cst_52 = arith.constant 0xFF800000 : f32
      %103 = vector.broadcast %cst_52 : f32 to vector<16x1xf32>
      %c0_53 = arith.constant 0 : index
      %c0_54 = arith.constant 0 : index
      %104 = vector.load %arg16[%c0_53, %c0_54] : memref<16x1xf32, #tpu.memory_space<vmem>>, vector<16x1xf32>
      tpu.vector_store %arg16[%c0_53, %c0_54], %103 {strides = array<i32>} : memref<16x1xf32, #tpu.memory_space<vmem>>, vector<16x1xf32>,
      %cst_55 = arith.constant 0.000000e+00 : f32
      %105 = vector.broadcast %cst_55 : f32 to vector<16x1xf32>
      %c0_56 = arith.constant 0 : index
      %c0_57 = arith.constant 0 : index
      %106 = vector.load %arg17[%c0_56, %c0_57] : memref<16x1xf32, #tpu.memory_space<vmem>>, vector<16x1xf32>
      tpu.vector_store %arg17[%c0_56, %c0_57], %105 {strides = array<i32>} : memref<16x1xf32, #tpu.memory_space<vmem>>, vector<16x1xf32>,
      %cst_58 = arith.constant 0.000000e+00 : f32
      %107 = vector.broadcast %cst_58 : f32 to vector<16x1xf32>
      %c0_59 = arith.constant 0 : index
      %c0_60 = arith.constant 0 : index
      %108 = vector.load %arg18[%c0_59, %c0_60] : memref<16x1xf32, #tpu.memory_space<vmem>>, vector<16x1xf32>
      tpu.vector_store %arg18[%c0_59, %c0_60], %107 {strides = array<i32>} : memref<16x1xf32, #tpu.memory_space<vmem>>, vector<16x1xf32>,
    } else {
    }
    %c0 = arith.constant 0 : index
    %c0_1 = arith.constant 0 : index
    %3 = vector.load %arg15[%c0, %c0_1] : memref<16x16xf32, #tpu.memory_space<vmem>>, vector<16x16xf32>
    %c0_2 = arith.constant 0 : index
    %c0_3 = arith.constant 0 : index
    %4 = vector.load %arg11[%c0_2, %c0_3] : memref<16x128xf32, #tpu.memory_space<vmem>>, vector<16x128xf32>
    %cst = arith.constant dense<0.000000e+00> : vector<16x128xf32>
    %5 = tpu.matmul %3, %4, %cst {dimension_numbers = #tpu.dot_dimension_numbers<[1], [0], [0], [1], [0, 0, 1, 1], [], []>} : vector<16x16xf32>, vector<16x128xf32>, vector<16x128xf32> -> vector<16x128xf32>
    %c0_4 = arith.constant 0 : index
    %c0_5 = arith.constant 0 : index
    %6 = vector.load %arg12[%c0_4, %c0_5] : memref<1x128xf32, #tpu.memory_space<vmem>>, vector<1x128xf32>
    %7 = vector.broadcast %6 : vector<1x128xf32> to vector<16x128xf32>
    %8 = arith.addf %5, %7 : vector<16x128xf32>
    %c0_6 = arith.constant 0 : index
    %c0_7 = arith.constant 0 : index
    %9 = vector.load %arg16[%c0_6, %c0_7] : memref<16x1xf32, #tpu.memory_space<vmem>>, vector<16x1xf32>
    %cst_8 = arith.constant dense<0xFF800000> : vector<16xf32>
    %10 = vector.multi_reduction <maximumf>, %8, %cst_8 [1] : vector<16x128xf32> to vector<16xf32>
    %11 = vector.shape_cast %10 : vector<16xf32> to vector<16x1xf32>
    %12 = arith.maximumf %9, %11 : vector<16x1xf32>
    %13 = arith.subf %9, %12 : vector<16x1xf32>
    %14 = math.exp %13 : vector<16x1xf32>
    %c0_9 = arith.constant 0 : index
    %c0_10 = arith.constant 0 : index
    %15 = vector.load %arg17[%c0_9, %c0_10] : memref<16x1xf32, #tpu.memory_space<vmem>>, vector<16x1xf32>
    %16 = arith.mulf %14, %15 : vector<16x1xf32>
    %17 = vector.broadcast %12 : vector<16x1xf32> to vector<16x128xf32>
    %18 = arith.subf %8, %17 : vector<16x128xf32>
    %19 = math.exp %18 : vector<16x128xf32>
    %cst_11 = arith.constant dense<0.000000e+00> : vector<16xf32>
    %20 = vector.multi_reduction <add>, %19, %cst_11 [1] : vector<16x128xf32> to vector<16xf32>
    %21 = vector.shape_cast %20 : vector<16xf32> to vector<16x1xf32>
    %22 = arith.addf %16, %21 : vector<16x1xf32>
    %c0_12 = arith.constant 0 : index
    %c0_13 = arith.constant 0 : index
    %23 = vector.load %arg17[%c0_12, %c0_13] : memref<16x1xf32, #tpu.memory_space<vmem>>, vector<16x1xf32>
    tpu.vector_store %arg17[%c0_12, %c0_13], %22 {strides = array<i32>} : memref<16x1xf32, #tpu.memory_space<vmem>>, vector<16x1xf32>,
    %c0_14 = arith.constant 0 : index
    %c0_15 = arith.constant 0 : index
    %24 = vector.load %arg16[%c0_14, %c0_15] : memref<16x1xf32, #tpu.memory_space<vmem>>, vector<16x1xf32>
    tpu.vector_store %arg16[%c0_14, %c0_15], %12 {strides = array<i32>} : memref<16x1xf32, #tpu.memory_space<vmem>>, vector<16x1xf32>,
    %25 = tpu.iota {dimensions = array<i32: 1>} : vector<16x128xi32>
    %c128_i32 = arith.constant 128 : i32
    %26 = arith.muli %arg1, %c128_i32 : i32
    %27 = vector.broadcast %26 : i32 to vector<16x128xi32>
    %28 = arith.addi %25, %27 : vector<16x128xi32>
    %c0_16 = arith.constant 0 : index
    %c0_17 = arith.constant 0 : index
    %29 = vector.load %arg3[%c0_16, %c0_17] : memref<16x1xi32, #tpu.memory_space<vmem>>, vector<16x1xi32>
    %30 = vector.broadcast %29 : vector<16x1xi32> to vector<16x128xi32>
    %31 = arith.cmpi eq, %28, %30 : vector<16x128xi32>
    %32 = arith.extui %31 : vector<16x128xi1> to vector<16x128xi32>
    %33 = arith.sitofp %32 : vector<16x128xi32> to vector<16x128xf32>
    %c0_18 = arith.constant 0 : index
    %c0_19 = arith.constant 0 : index
    %34 = vector.load %arg18[%c0_18, %c0_19] : memref<16x1xf32, #tpu.memory_space<vmem>>, vector<16x1xf32>
    %35 = arith.mulf %33, %8 : vector<16x128xf32>
    %cst_20 = arith.constant dense<0.000000e+00> : vector<16xf32>
    %36 = vector.multi_reduction <add>, %35, %cst_20 [1] : vector<16x128xf32> to vector<16xf32>
    %37 = vector.shape_cast %36 : vector<16xf32> to vector<16x1xf32>
    %38 = arith.addf %34, %37 : vector<16x1xf32>
    %c0_21 = arith.constant 0 : index
    %c0_22 = arith.constant 0 : index
    %39 = vector.load %arg18[%c0_21, %c0_22] : memref<16x1xf32, #tpu.memory_space<vmem>>, vector<16x1xf32>
    tpu.vector_store %arg18[%c0_21, %c0_22], %38 {strides = array<i32>} : memref<16x1xf32, #tpu.memory_space<vmem>>, vector<16x1xf32>,
    %c1_i32 = arith.constant 1 : i32
    %40 = arith.cmpi eq, %arg1, %c1_i32 : i32
    %41 = arith.extui %40 : i1 to i32
    %c0_i32_23 = arith.constant 0 : i32
    %42 = arith.cmpi ne, %41, %c0_i32_23 : i32
    scf.if %42 {
      %c0_24 = arith.constant 0 : index
      %c0_25 = arith.constant 0 : index
      %43 = vector.load %arg16[%c0_24, %c0_25] : memref<16x1xf32, #tpu.memory_space<vmem>>, vector<16x1xf32>
      %c0_26 = arith.constant 0 : index
      %c0_27 = arith.constant 0 : index
      %44 = vector.load %arg17[%c0_26, %c0_27] : memref<16x1xf32, #tpu.memory_space<vmem>>, vector<16x1xf32>
      %45 = math.log %44 : vector<16x1xf32>
      %46 = arith.addf %43, %45 : vector<16x1xf32>
      %c0_28 = arith.constant 0 : index
      %c0_29 = arith.constant 0 : index
      %47 = vector.load %arg18[%c0_28, %c0_29] : memref<16x1xf32, #tpu.memory_space<vmem>>, vector<16x1xf32>
      %48 = arith.subf %46, %47 : vector<16x1xf32>
      %c0_30 = arith.constant 0 : index
      %c0_31 = arith.constant 0 : index
      %49 = vector.load %arg14[%c0_30, %c0_31] : memref<16x1xf32, #tpu.memory_space<vmem>>, vector<16x1xf32>
      tpu.vector_store %arg14[%c0_30, %c0_31], %48 {strides = array<i32>} : memref<16x1xf32, #tpu.memory_space<vmem>>, vector<16x1xf32>,
    } else {
    }
    return
  }
  func.func @transform_0(%arg0: i32, %arg1: i32) -> (i32, i32) {
    %c0_i32 = arith.constant 0 : i32
    %c0_i32_0 = arith.constant 0 : i32
    return %arg0, %c0_i32 : i32, i32
  }
  func.func @transform_1(%arg0: i32, %arg1: i32) -> (i32, i32) {
    %c0_i32 = arith.constant 0 : i32
    %c0_i32_0 = arith.constant 0 : i32
    return %arg0, %c0_i32 : i32, i32
  }
  func.func @transform_2(%arg0: i32, %arg1: i32) -> (i32, i32) {
    %c1_i32 = arith.constant 1 : i32
    %c0_i32 = arith.constant 0 : i32
    %0 = arith.cmpi eq, %c1_i32, %c0_i32 : i32
    %c1_i32_0 = arith.constant 1 : i32
    %1 = arith.select %0, %c1_i32_0, %c1_i32 : i32
    %2 = arith.remsi %arg0, %1 : i32
    %c0_i32_1 = arith.constant 0 : i32
    %3 = arith.cmpi ne, %2, %c0_i32_1 : i32
    %c0_i32_2 = arith.constant 0 : i32
    %4 = arith.cmpi slt, %2, %c0_i32_2 : i32
    %c0_i32_3 = arith.constant 0 : i32
    %5 = arith.cmpi slt, %1, %c0_i32_3 : i32
    %6 = arith.xori %4, %5 : i1
    %7 = arith.andi %6, %3 : i1
    %8 = arith.addi %2, %1 : i32
    %9 = arith.select %7, %8, %2 : i32
    %c0_i32_4 = arith.constant 0 : i32
    %c0_i32_5 = arith.constant 0 : i32
    return %9, %c0_i32_4 : i32, i32
  }
  func.func @transform_3(%arg0: i32, %arg1: i32) -> (i32, i32) {
    %c0_i32 = arith.constant 0 : i32
    %c0_i32_0 = arith.constant 0 : i32
    %c0_i32_1 = arith.constant 0 : i32
    return %c0_i32, %c0_i32_0 : i32, i32
  }
  func.func @transform_4(%arg0: i32, %arg1: i32) -> (i32, i32) {
    %c0_i32 = arith.constant 0 : i32
    %c0_i32_0 = arith.constant 0 : i32
    %c0_i32_1 = arith.constant 0 : i32
    return %c0_i32, %c0_i32_0 : i32, i32
  }
  func.func @transform_5(%arg0: i32, %arg1: i32) -> (i32, i32) {
    %c0_i32 = arith.constant 0 : i32
    %c0_i32_0 = arith.constant 0 : i32
    %c0_i32_1 = arith.constant 0 : i32
    return %c0_i32, %c0_i32_0 : i32, i32
  }
  func.func @transform_6(%arg0: i32, %arg1: i32) -> (i32, i32) {
    %c0_i32 = arith.constant 0 : i32
    %c0_i32_0 = arith.constant 0 : i32
    %c0_i32_1 = arith.constant 0 : i32
    return %c0_i32, %c0_i32_0 : i32, i32
  }
  func.func @transform_7(%arg0: i32, %arg1: i32) -> (i32, i32) {
    %c0_i32 = arith.constant 0 : i32
    %c0_i32_0 = arith.constant 0 : i32
    %c0_i32_1 = arith.constant 0 : i32
    return %c0_i32, %c0_i32_0 : i32, i32
  }
  func.func @transform_8(%arg0: i32, %arg1: i32) -> (i32, i32) {
    %c0_i32 = arith.constant 0 : i32
    %c0_i32_0 = arith.constant 0 : i32
    %c0_i32_1 = arith.constant 0 : i32
    return %c0_i32, %c0_i32_0 : i32, i32
  }
  func.func @transform_9(%arg0: i32, %arg1: i32) -> (i32, i32) {
    %c0_i32 = arith.constant 0 : i32
    %c0_i32_0 = arith.constant 0 : i32
    return %c0_i32, %arg1 : i32, i32
  }
  func.func @transform_10(%arg0: i32, %arg1: i32) -> (i32, i32) {
    %c0_i32 = arith.constant 0 : i32
    %c0_i32_0 = arith.constant 0 : i32
    return %c0_i32, %arg1 : i32, i32
  }
  func.func @transform_11(%arg0: i32, %arg1: i32) -> (i32, i32) {
    %c0_i32 = arith.constant 0 : i32
    %c0_i32_0 = arith.constant 0 : i32
    return %arg0, %c0_i32 : i32, i32
  }
  func.func @transform_12(%arg0: i32, %arg1: i32) -> (i32, i32) {
    %c0_i32 = arith.constant 0 : i32
    %c0_i32_0 = arith.constant 0 : i32
    return %arg0, %c0_i32 : i32, i32
  }
}

</mosaic_0001>

<bundles_post_ra>
// kernel: glyph_position_embedder_forward.1
= control target key start
LH: loop header
LB: loop body
LE: loop exit
PB: predicated region body
PF: predicated region fallthrough
CT: control target
= control target key end

     0   :  { %s2233_s0 = inlined_call_operand.vmem [shape: bf16[32,64], index: 0, kind: input, shape index: {}]   ;;  %s2234_s1 = inlined_call_operand.vmem [shape: s32[32,1], index: 1, kind: input, shape index: {}]   ;;  %s2235_s2 = inlined_call_operand.vmem [shape: f32[16,128], index: 2, kind: input, shape index: {}]   ;;  %s2236_s3 = inlined_call_operand.vmem [shape: f32[64,640], index: 3, kind: input, shape index: {}]   ;;  %s2237_s4 = inlined_call_operand.vmem [shape: f32[1,640], index: 4, kind: input, shape index: {}]   ;;  %s2238_s5 = inlined_call_operand.vmem [shape: f32[16,128], index: 5, kind: input, shape index: {}]   ;;  %s2239_s6 = inlined_call_operand.vmem [shape: f32[1,128], index: 6, kind: input, shape index: {}]   ;;  %s2240_s7 = inlined_call_operand.vmem [shape: f32[1,128], index: 7, kind: input, shape index: {}]   ;;  %s2241_s8 = inlined_call_operand.vmem [shape: f32[1,128], index: 8, kind: input, shape index: {}]   ;;  %s2242_s9 = inlined_call_operand.vmem [shape: f32[16,256], index: 9, kind: input, shape index: {}]   ;;  %s2243_s10 = inlined_call_operand.vmem [shape: f32[1,256], index: 10, kind: input, shape index: {}]   ;;  %s2244_s11 = inlined_call_operand.hbm [shape: f32[32,128], index: 11, kind: output, shape index: {0}]   ;;  %s2245_s12 = inlined_call_operand.vmem [shape: f32[32,1], index: 12, kind: output, shape index: {1}]  }
   0x1   :  { %2260 = sst [smem:[#allocation22_spill]] %s2240_s7 }
   0x2   :  { %2261 = sst [smem:[#allocation23_spill]] %s2241_s8 }
   0x3   :  { %2262 = sst [smem:[#allocation24_spill]] %s2242_s9 }
   0x4   :  { %2263 = sst [smem:[#allocation25_spill]] %s2244_s11 }
   0x5   :  { %18 = vsyncpa [#allocation8], 0 }
   0x6   :  { %20 = vsyncpa [#allocation8 + $0x1], 0  ;;  %s1846_s21 = smov 0   ;;  %s1848_s22 = smov 0  }
   0x7   :  { %s1850_s23 = smov 0   ;;  %s1852_s24 = smov 0  }
   0x8   :  { %s1854_s25 = smov 0   ;;  %s1856_s26 = smov 0  }
   0x9   :  { %s1858_s27 = smov 0   ;;  %s1860_s28 = smov 0  }
   0xa   :  { %s1862_s29 = smov 0   ;;  %s1864_s30 = smov 0  }
   0xb LB: > { %2264 = sst [smem:[#allocation10_spill]] %s1733_s21  ;;  %s1394_s13 = sadd.s32 4294967295, %s1769_s30   ;;  %s1769_s30 = sphi %s1864_s30, %s26_s30   ;;  %s1765_s29 = sphi %s1862_s29, %s2295_s29   ;;  %s1761_s28 = sphi %s1860_s28, %s2294_s28   ;;  %s1757_s27 = sphi %s1858_s27, %s2298_s27   ;;  %s1753_s26 = sphi %s1856_s26, %s2292_s26   ;;  %s1749_s25 = sphi %s1854_s25, %s2291_s25   ;;  %s1745_s24 = sphi %s1852_s24, %s2290_s24   ;;  %s1741_s23 = sphi %s1850_s23, %s2289_s23   ;;  %s1737_s22 = sphi %s1848_s22, %s2297_s22   ;;  %s1733_s21 = sphi %s1846_s21, %s2296_s21  }
   0xc   : > { %2265 = sst [smem:[#allocation11_spill]] %s1741_s23  ;;  %s1395_s14 = sadd.s32 4294967294, %s1769_s30  }
   0xd   : > { %2266 = sst [smem:[#allocation12_spill]] %s1749_s25  ;;  %s35_s15 = sadd.s32 1, %s1761_s28 }
   0xe   : > { %2267 = sst [smem:[#allocation13_spill]] %s1761_s28  ;;  %s38_s16 = sadd.s32 1, %s1765_s29 }
   0xf   : > { %2268 = sst [smem:[#allocation14_spill]] %s1765_s29  ;;  %p36_p0 = scmp.ge.s32.totalorder %s35_s15, 2 }
  0x10   : > { %2269 = sst [smem:[#allocation15_spill]] %s1769_s30  ;;  %s244_s17 = sadd.s32 1, %s1749_s25 }
  0x11   : > { %p251_p1 = scmp.ne.s32.totalorder %s1749_s25, %s1745_s24  ;;  %p252_p2 = scmp.eq.s32.totalorder %s1769_s30, 0 }
  0x12   : > { %s2300_s15 = smov (%p36_p0, %s35_s15), 0  ;;  %s2302_s16 = smov (!%p36_p0, %s38_s16), %s1765_s29 }
  0x13   : > { %2270 = sst [smem:[#allocation16_spill]] %s2300_s15  ;;  %s241_s18 = ssub.s32 %s1761_s28, %s2300_s15 }
  0x14   : > { %p1909_p3 = por %p252_p2, %p251_p1  ;;  %p40_p4 = scmp.ge.s32.totalorder %s2302_s16, 2 }
  0x15   : > { %p242_p5 = scmp.eq.s32.totalorder %s241_s18, 0  ;;  %s296_s20 = sadd.s32 1, %s1741_s23 }
  0x16   : > { %p306_p6 = scmp.ne.s32.totalorder %s1741_s23, %s1737_s22  ;;  %s2304_s16 = smov (%p40_p4, %s2302_s16), 0 }
  0x17   : > { %2272 = sst [smem:[#allocation17_spill]] %s2304_s16  ;;  %s293_s8 = ssub.s32 %s1765_s29, %s2304_s16 }
  0x18   : > { %s1919_s11 = scalar_select %p242_p5, %s1749_s25, %s244_s17  }
  0x19   : > { %p307_p7 = scmp.eq.s32.totalorder %s1394_s13, 3  ;;  %p294_p8 = scmp.eq.s32.totalorder %s293_s8, 0 }
  0x1a   : > { %2273 = sst [smem:[#allocation18_spill]] %s1919_s11  ;;  %p312_p9 = scmp.ne.s32.totalorder %s1737_s22, %s1733_s21 }
  0x1b   : > { %p1925_p10 = por %p307_p7, %p306_p6  ;;  %p313_p11 = scmp.eq.s32.totalorder %s1395_s14, 3 }
  0x1c   : > { %s1930_s15 = scalar_select %p294_p8, %s1741_s23, %s296_s20  }
  0x1d   : > { %s2274_s7 = scalar_select %p1925_p10, 1, 0 }
  0x1e   : > { %2276 = sst [smem:[#allocation20_spill]] %s1930_s15  ;;  %p1932_p12 = por %p313_p11, %p312_p9 }
  0x1f   : > { %2275 = sst [smem:[#allocation19_spill]] %s2274_s7  ;;  %p1397_p13 = scmp.ge.s32.totalorder %s1769_s30, 4 }
  0x20   : > { %s2277_s18 = scalar_select %p1932_p12, 1, 0 }
  0x21   : > { %376 = sbr.rel (%p1397_p13) target bundleno = 51 (0x33), region = 44 }
  0x22   : > { %2278 = sst [smem:[#allocation21_spill]] %s2277_s18 }
  0x28   : > { %397 = sbr.rel (!%p1909_p3) target bundleno = 51 (0x33), region = 56  ;;  %s399_s8 = sand.u32 (%p1909_p3), 1, %s1749_s25  }
  0x29   : > { %s1399_s13 = sshll.u32 (%p1909_p3), %s1761_s28, 3  ;;  %s1398_s17 = sshll.u32 (%p1909_p3), %s399_s8, 4 }
  0x2a   : > { %s2279_s9 = sld [smem:[#allocation24_spill]] (%p1909_p3)  ;;  %s401_s20 = scalar_lea.vmem (%p1909_p3), [#allocation6], %s1398_s17 }
  0x30   : > { %s403_s14 = scalar_lea.vmem %s2279_s9, %s1399_s13 }
  0x31   : > { %v433_v0 = vld [vmem:[%s403_s14] sm:$0xff]  ;;  %v435_v1 = vld [vmem:[%s403_s14 + $0x10] sm:$0xff] }
  0x32   : > { %434 = vst [vmem:[%s401_s20] sm:$0xff] %v433_v0  ;;  %436 = vst [vmem:[%s401_s20 + $0x8] sm:$0xff] %v435_v1 }
  0x33 PF: > { %p1400_p0 = scmp.ge.s32.totalorder %s1769_s30, 1  ;;  %p447_p1 = scmp.lt.s32.totalorder %s1769_s30, 5 }
  0x35   : > { %p448_p2 = pnand %p1400_p0, %p447_p1 }
  0x36   : > { %s454_s29 = sand.u32 (!%p448_p2), 1, %s1745_s24   ;;  %s2252_s16 = sand.u32 (!%p448_p2), 1, %s1737_s22  }
  0x37   : > { %451 = sbr.rel (%p448_p2) target bundleno = 1779 (0x6f3), region = 98  ;;  %s1948_s19 = sshll.u32 (!%p448_p2), %s454_s29, 4 }
  0x38   : > { %s1402_s8 = sshll.u32 (!%p448_p2), %s2252_s16, 4  ;;  %s1403_s13 = sshll.u32 (!%p448_p2), %s1757_s27, 1 }
  0x39   : > { %p525_p3 = scmp.lt.s32.totalorder (!%p448_p2), %s1753_s26, 1  ;;  %p514_p4 = scmp.lt.s32.totalorder (!%p448_p2), %s1403_s13, 3 }
  0x3a   : > { %s456_s7 = scalar_lea.vmem (!%p448_p2), [#allocation6], %s1948_s19  ;;  %s1977_s14 = scalar_lea.vmem (!%p448_p2), [#allocation7], %s1402_s8 }
  0x3b   : > { %p1409_p5 = scmp.ne.s32.totalorder (!%p448_p2), %s1753_s26, 0 }
  0x3e   : > { %s1955_s17 = scalar_select %p525_p3, %s1753_s26, 1 }
  0x3f   : > { %s2306_s13 = smov (!%p514_p4, %s1403_s13), 3  ;;  %538 = sbr.rel (%p1409_p5) target bundleno = 1064 (0x428), region = 106 }
  0x40   : > { %s527_s9 = scalar_lea.vmem %s2243_s10, %s1955_s17  ;;  %s1404_s28 = sshll.u32 %s2306_s13, 2  ;;  %v544_v2 = vld [vmem:[%s2236_s3 + $0x8] sm:$0xff] (!%p1409_p5)  ;;  %v549_v3 = vld [vmem:[%s2236_s3 + $0x30] sm:$0xff] (!%p1409_p5)  ;;  %v543_v4 = vld [vmem:[%s2236_s3] sm:$0xff] (!%p1409_p5)  ;;  %vm1038_vm0 = vcmask (!%p1409_p5), 7168   ;;  %v1771_v9 = vmov (!%p1409_p5), 0.0  }
  0x41   : > { %s1406_s11 = sshll.u32 %s2306_s13, 3  ;;  %s1964_s29 = scalar_lea.vmem %s2233_s0, %s1404_s28  ;;  %v1489_v5 = vpack.c.bf16 (!%p1409_p5), %v549_v3, %v544_v2  ;;  %v548_v6 = vld [vmem:[%s2236_s3 + $0x28] sm:$0xff] (!%p1409_p5)  ;;  %v546_v7 = vld [vmem:[%s2236_s3 + $0x18] sm:$0xff] (!%p1409_p5)  ;;  %v551_v8 = vld [vmem:[%s2236_s3 + $0x40] sm:$0xff] (!%p1409_p5)  ;;  %681 = vmatprep.mubr.f32.mxu0 (!%p1409_p5), %v1771_v9  ;;  %v1772_v10 = vmov (!%p1409_p5), -inf   ;;  %1041 = vst.msk [vmem:[#allocation4] sm:$0xff] (!%p1409_p5), %vm1038_vm0, %v1771_v9  ;;  %758 = vmatprep.mubr.f32.mxu1 (!%p1409_p5), %v1771_v9  ;;  %v585_v3 = vlaneseq (!%p1409_p5) }
  0x42   : > { %s1969_s23 = scalar_lea.vmem %s2234_s1, %s1406_s11  ;;  %s1974_s30 = scalar_lea.vmem %s2245_s12, %s1406_s11  ;;  %1039 = vst.msk [vmem:[#allocation3] sm:$0xff] (!%p1409_p5), %vm1038_vm0, %v1772_v10  ;;  %1040 = vst.msk [vmem:[#allocation3 + $0x8] sm:$0xff] (!%p1409_p5), %vm1038_vm0, %v1772_v10  ;;  %v1491_v11 = vpack.c.bf16 (!%p1409_p5), %v548_v6, %v543_v4  ;;  %v1505_v12 = vpack.c.bf16 (!%p1409_p5), %v551_v8, %v546_v7  ;;  %v554_v13 = vld [vmem:[%s2236_s3 + $0x58] sm:$0xff] (!%p1409_p5)  ;;  %v559_v14 = vld [vmem:[%s2236_s3 + $0x80] sm:$0xff] (!%p1409_p5)  ;;  %vm610_vm1 = vcmask (!%p1409_p5), 523264   ;;  %vm894_vm2 = vcmask (!%p1409_p5), 130048  }
  0x43   : > { %1042 = vst.msk [vmem:[#allocation4 + $0x8] sm:$0xff] (!%p1409_p5), %vm1038_vm0, %v1771_v9  ;;  %1043 = vst.msk [vmem:[#allocation5] sm:$0xff] (!%p1409_p5), %vm1038_vm0, %v1771_v9  ;;  %v545_v15 = vld [vmem:[%s2236_s3 + $0x10] sm:$0xff] (!%p1409_p5)  ;;  %1490 = vmatprep.subr.bf16.mxu0 (!%p1409_p5), %v1489_v5  ;;  %v1493_v16 = vpack.c.bf16 (!%p1409_p5), %v559_v14, %v554_v13  ;;  %v550_v17 = vld [vmem:[%s2236_s3 + $0x38] sm:$0xff] (!%p1409_p5)  ;;  %v586_v4 = vshrl.u32 (!%p1409_p5), %v585_v3, 7  ;;  %s1773_s15 = smov (!%p1409_p5), 64  }
  0x44   : > { %1044 = vst.msk [vmem:[#allocation5 + $0x8] sm:$0xff] (!%p1409_p5), %vm1038_vm0, %v1771_v9  ;;  %v553_v18 = vld [vmem:[%s2236_s3 + $0x50] sm:$0xff] (!%p1409_p5)  ;;  %v558_v19 = vld [vmem:[%s2236_s3 + $0x78] sm:$0xff] (!%p1409_p5)  ;;  %1492 = vmatpush1.bf16.msra.mxu0 (!%p1409_p5), %v1491_v11  ;;  %1506 = vmatprep.subr.bf16.mxu1 (!%p1409_p5), %v1505_v12  ;;  %v1507_v20 = vpack.c.bf16 (!%p1409_p5), %v550_v17, %v545_v15  ;;  %v556_v22 = vld [vmem:[%s2236_s3 + $0x68] sm:$0xff] (!%p1409_p5)  ;;  %s1774_s18 = smov (!%p1409_p5), 96   ;;  %s1775_s8 = smov (!%p1409_p5), 112  }
  0x45   : > { %v1495_v21 = vpack.c.bf16 (!%p1409_p5), %v558_v19, %v553_v18  ;;  %v561_v23 = vld [vmem:[%s2236_s3 + $0x90] sm:$0xff] (!%p1409_p5)  ;;  %v564_v24 = vld [vmem:[%s2236_s3 + $0xa8] sm:$0xff] (!%p1409_p5)  ;;  %1494 = vmatprep.subr.bf16.mxu0 (!%p1409_p5), %v1493_v16  ;;  %v555_v27 = vld [vmem:[%s2236_s3 + $0x60] sm:$0xff] (!%p1409_p5)  ;;  %v587_v5 = vsub.s32 (!%p1409_p5), 0, %v586_v4  ;;  %v591_v7 = vsub.s32 (!%p1409_p5), 1, %v586_v4  ;;  %v595_v8 = vsub.s32 (!%p1409_p5), 2, %v586_v4 }
  0x46   : > { %v1509_v25 = vpack.c.bf16 %v561_v23, %v556_v22  ;;  %v569_v26 = vld [vmem:[%s2236_s3 + $0xd0] sm:$0xff]  ;;  %v560_v28 = vld [vmem:[%s2236_s3 + $0x88] sm:$0xff]  ;;  %1508 = vmatpush1.bf16.msra.mxu1 %v1507_v20  ;;  %v563_v31 = vld [vmem:[%s2236_s3 + $0xa0] sm:$0xff]  ;;  %s2280_s11 = sld [smem:[#allocation22_spill]] }
  0x47   : > { %v1497_v29 = vpack.c.bf16 %v569_v26, %v564_v24  ;;  %v1511_v30 = vpack.c.bf16 %v560_v28, %v555_v27  ;;  %v568_v32 = vld [vmem:[%s2236_s3 + $0xc8] sm:$0xff]  ;;  %v566_v33 = vld [vmem:[%s2236_s3 + $0xb8] sm:$0xff]  ;;  %v571_v34 = vld [vmem:[%s2236_s3 + $0xe0] sm:$0xff] }
  0x48   : > { %1510 = vmatprep.subr.bf16.mxu1 %v1509_v25  ;;  %v574_v35 = vld [vmem:[%s2236_s3 + $0xf8] sm:$0xff]  ;;  %v579_v36 = vld [vmem:[%s2236_s3 + $0x120] sm:$0xff]  ;;  %1496 = vmatpush1.bf16.msra.mxu0 %v1495_v21  ;;  %v1499_v37 = vpack.c.bf16 %v568_v32, %v563_v31  ;;  %v1513_v38 = vpack.c.bf16 %v571_v34, %v566_v33  ;;  %v565_v39 = vld [vmem:[%s2236_s3 + $0xb0] sm:$0xff] }
  0x49   : > { %v570_v40 = vld [vmem:[%s2236_s3 + $0xd8] sm:$0xff]  ;;  %v573_v41 = vld [vmem:[%s2236_s3 + $0xf0] sm:$0xff]  ;;  %1498 = vmatprep.subr.bf16.mxu0 %v1497_v29  ;;  %v1501_v42 = vpack.c.bf16 %v579_v36, %v574_v35  ;;  %v576_v44 = vld [vmem:[%s2236_s3 + $0x108] sm:$0xff] }
  0x4a   : > { %v578_v43 = vld [vmem:[%s2236_s3 + $0x118] sm:$0xff]  ;;  %v581_v45 = vld [vmem:[%s2236_s3 + $0x130] sm:$0xff]  ;;  %1512 = vmatpush1.bf16.msra.mxu1 %v1511_v30  ;;  %v1515_v46 = vpack.c.bf16 %v570_v40, %v565_v39  ;;  %v575_v47 = vld [vmem:[%s2236_s3 + $0x100] sm:$0xff]  ;;  %v603_v39 = vsub.s32 4, %v586_v4 }
  0x4b   : > { %1514 = vmatprep.subr.bf16.mxu1 %v1513_v38  ;;  %v1517_v48 = vpack.c.bf16 %v581_v45, %v576_v44  ;;  %v580_v49 = vld [vmem:[%s2236_s3 + $0x128] sm:$0xff]  ;;  %v547_v50 = vld [vmem:[%s2236_s3 + $0x20] sm:$0xff]  ;;  %v1503_v52 = vpack.c.bf16 %v578_v43, %v573_v41  ;;  %v557_v56 = vld [vmem:[%s2236_s3 + $0x70] sm:$0xff] }
  0x4c   : > { %v552_v51 = vld [vmem:[%s2236_s3 + $0x48] sm:$0xff]  ;;  %1500 = vmatpush1.bf16.msra.mxu0 %v1499_v37  ;;  %v1435_v53 = vld [vmem:[%s1964_s29] sm:$0xff]   ;;  %v1519_v55 = vpack.c.bf16 %v580_v49, %v575_v47  ;;  %v562_v57 = vld [vmem:[%s2236_s3 + $0x98] sm:$0xff] }
  0x4d   : > { %1502 = vmatprep.subr.bf16.mxu0 %v1501_v42  ;;  %v1521_v54 = vpack.c.bf16 %v552_v51, %v547_v50  ;;  %v1436_v58 = vunpack.c.l.bf16 %v1435_v53  ;;  %v1525_v59 = vpack.c.bf16 %v562_v57, %v557_v56  ;;  %v567_v60 = vld [vmem:[%s2236_s3 + $0xc0] sm:$0xff]  ;;  %v572_v61 = vld [vmem:[%s2236_s3 + $0xe8] sm:$0xff]  ;;  %v1437_v62 = vunpack.c.h.bf16 %v1435_v53  ;;  %v577_v0 = vld [vmem:[%s2236_s3 + $0x110] sm:$0xff] }
  0x4e   : > { %1516 = vmatpush1.bf16.msra.mxu1 %v1515_v46  ;;  %v1529_v63 = vpack.c.bf16 %v572_v61, %v567_v60  ;;  %v582_v1 = vld [vmem:[%s2236_s3 + $0x138] sm:$0xff]  ;;  %v583_v6 = vld [vmem:[%s2237_s4] sm:$0x1f] }
  0x4f   : > { %1518 = vmatprep.subr.bf16.mxu1 %v1517_v48  ;;  %v1533_v2 = vpack.c.bf16 %v582_v1, %v577_v0  ;;  %v588_v10 = vrot.slane %v583_v6, %v587_v5  ;;  %v592_v11 = vrot.slane %v583_v6, %v591_v7  ;;  %v596_v12 = vrot.slane %v583_v6, %v595_v8  ;;  %v1416_v5 = vld [vmem:[%s2239_s6] ss:$0 sm:$0xff]  ;;  %v988_v7 = vld [vmem:[%s2235_s2 + $0x8] sm:$0xff] }
  0x50   : > { %1504 = vmatpush1.bf16.msra.mxu0 %v1503_v52  ;;  %v604_v44 = vrot.slane %v583_v6, %v603_v39 }
  0x51   : > { %1522 = vmatprep.subr.bf16.mxu0 %v1521_v54 }
  0x52   : > { %1520 = vmatpush1.bf16.msra.mxu1 %v1519_v55  ;;  %v898_v55 = vld [vmem:[%s2238_s5 + $0x8] sm:$0xff] }
  0x53   : > { %1410 = vmatmul.mubr.msk.f32.vlgmr.msra.gmra.mrb[0].mxu0 %vm610_vm1, %v1436_v58 }
  0x54   : > { %1524 = vmatpush3.bf16.msra.mxu0 %v1521_v54  ;;  %687 = vmatprep.mubr.f32.mxu0 %v1771_v9  ;;  %v897_v54 = vld [vmem:[%s2238_s5] sm:$0xff] }
  0x55   : > { %1412 = vmatmul.mubr.msk.f32.vlgmr.msra.gmra.mrb[0].mxu1 %vm610_vm1, %v1436_v58  ;;  %1526 = vmatprep.subr.bf16.mxu0 %v1525_v59  ;;  %v1537_v56 = vpack.c.bf16 %v898_v55, %v897_v54 }
  0x56   : > { %764 = vmatprep.mubr.f32.mxu1 %v1771_v9  ;;  %v599_v9 = vsub.s32 3, %v586_v4 }
  0x57   : > { %1411 = vmatmul.mubr.msk.f32.gmra.mrb[2].mxu0 %vm610_vm1, %v1437_v62  ;;  %1538 = vmatprep.subr.bf16.mxu1 %v1537_v56 }
  0x58   : > { %1528 = vmatpush3.bf16.msra.mxu0 %v1525_v59  ;;  %1472 = vmatprep.mubr.msk.f32.mxu0 %vm610_vm1, %v1436_v58  ;;  %v600_v14 = vrot.slane %v583_v6, %v599_v9 }
  0x59   : > { %1530 = vmatprep.subr.bf16.mxu0 %v1529_v63  ;;  %1413 = vmatmul.mubr.msk.f32.gmra.mrb[2].mxu1 %vm610_vm1, %v1437_v62 }
  0x5a   : > { %1540 = vmatpush3.bf16.msra.mxu1 %v1537_v56 }
  0x5c   : > { %1532 = vmatpush3.bf16.msra.mxu0 %v1529_v63 }
  0x5d   : > { %1534 = vmatprep.subr.bf16.mxu0 %v1533_v2 }
  0x60   : > { %1536 = vmatpush3.bf16.msra.mxu0 %v1533_v2 }
  0x63   : > { %1473 = vmatmul.mubr.msk.f32.vlgmr.msra.gmra.mrb[4].mxu0 %vm610_vm1, %v1437_v62 }
 0x126   : > { %v683_v13 = vpop.f32.mrb[0].mxu0 }
 0x127   : > { %v684_v15 = vadd.f32 %v683_v13, %v588_v10  ;;  %v685_v16 = vpop.f32.mrb[1].mxu0 }
 0x128   : > { %v686_v17 = vadd.f32 %v685_v16, %v592_v11  ;;  %v760_v18 = vpop.f32.mrb[0].mxu1 }
 0x129   : > { %v846_v19 = vmax.f32 %v684_v15, 0.0  ;;  %v761_v20 = vadd.f32 %v760_v18, %v596_v12  ;;  %v762_v21 = vpop.f32.mrb[1].mxu1 }
 0x12a   : > { %v847_v22 = vmax.f32 %v686_v17, 0.0  ;;  %v763_v23 = vadd.f32 %v762_v21, %v600_v14  ;;  %v689_v24 = vpop.f32.mrb[2].mxu0 }
 0x12b   : > { %v848_v25 = vmax.f32 %v761_v20, 0.0  ;;  %v690_v26 = vadd.f32 %v689_v24, %v588_v10  ;;  %v691_v27 = vpop.f32.mrb[3].mxu0  ;;  %v987_v10 = vld [vmem:[%s2235_s2] sm:$0xff] }
 0x12c   : > { %v856_v28 = vmax.f32 %v846_v19, %v847_v22  ;;  %v849_v29 = vmax.f32 %v763_v23, 0.0  ;;  %v692_v30 = vadd.f32 %v691_v27, %v592_v11  ;;  %v766_v31 = vpop.f32.mrb[2].mxu1 }
 0x12d   : > { %v851_v32 = vmax.f32 %v690_v26, 0.0  ;;  %v767_v33 = vadd.f32 %v766_v31, %v596_v12  ;;  %v768_v34 = vpop.f32.mrb[3].mxu1 }
 0x12e   : > { %v858_v35 = vmax.f32 %v856_v28, %v848_v25  ;;  %v852_v36 = vmax.f32 %v692_v30, 0.0  ;;  %v769_v37 = vadd.f32 %v768_v34, %v600_v14 }
 0x12f   : > { %v853_v38 = vmax.f32 %v767_v33, 0.0 }
 0x130   : > { %v860_v40 = vmax.f32 %v858_v35, %v849_v29  ;;  %v857_v41 = vmax.f32 %v851_v32, %v852_v36  ;;  %v854_v42 = vmax.f32 %v769_v37, 0.0  ;;  %v1419_v32 = vld [vmem:[%s2280_s11] ss:$0 sm:$0xff] }
 0x132   : > { %v859_v43 = vmax.f32 %v857_v41, %v853_v38 }
 0x134   : > { %v861_v45 = vmax.f32 %v859_v43, %v854_v42 }
 0x136   : > { %v1474_v46 = vpop.f32.mrb[4].mxu0 }
 0x137   : > { %v843_v47 = vadd.f32 %v1474_v46, %v604_v44  ;;  %v837_v48 = vpop.f32.mrb[5].mxu0 }
 0x138   : > { %v838_v49 = vadd.f32 %v837_v48, %v604_v44 }
 0x139   : > { %v855_v50 = vmax.f32 %v843_v47, 0.0 }
 0x13a   : > { %v850_v51 = vmax.f32 %v838_v49, 0.0 }
 0x13b   : > { %v863_v52 = vmax.f32 %v861_v45, %v855_v50 }
 0x13c   : > { %v862_v53 = vmax.f32 %v860_v40, %v850_v51 }
 0x13e   : > { %866 = vrot.lane.b32.xlu0 %v862_v53, %s1773_s15 }
 0x142   : > { %868 = vrot.lane.b32.xlu0 %v863_v52, %s1773_s15 }
 0x1b0   : > { %v867_v57 = vpop.permute.xlu0 %866 }
 0x1b1   : > { %v872_v58 = vmax.f32 %v862_v53, %v867_v57 }
 0x1b3   : > { %876 = vrot.lane.b32.xlu1 %v872_v58, %s1774_s18 }
 0x1b4   : > { %v869_v59 = vpop.permute.xlu0 %868 }
 0x1b5   : > { %v873_v60 = vmax.f32 %v863_v52, %v869_v59 }
 0x1b7   : > { %878 = vrot.lane.b32.xlu1 %v873_v60, %s1774_s18 }
 0x225   : > { %v877_v61 = vpop.permute.xlu1 %876 }
 0x226   : > { %v882_v62 = vmax.f32 %v872_v58, %v877_v61 }
 0x228   : > { %886 = vrot.lane.b32.xlu0 %v882_v62, %s1775_s8 }
 0x229   : > { %v879_v63 = vpop.permute.xlu1 %878 }
 0x22a   : > { %v883_v0 = vmax.f32 %v873_v60, %v879_v63 }
 0x22c   : > { %888 = vrot.lane.b32.xlu1 %v883_v0, %s1775_s8  ;;  %s2281_s8 = sld [smem:[#allocation23_spill]] }
 0x232   : > { %v1420_v34 = vld [vmem:[%s2281_s8] ss:$0 sm:$0xff] }
 0x29a   : > { %v887_v1 = vpop.permute.xlu0 %886 }
 0x29b   : > { %v892_v2 = vmax.f32 %v882_v62, %v887_v1 }
 0x29d   : > { %895 = vst.msk [vmem:[#allocation2] sm:$0xff] %vm894_vm2, %v892_v2  ;;  %1479 = vmatprep.mubr.msk.f32.mxu1 %vm894_vm2, %v892_v2 }
 0x29e   : > { %v889_v3 = vpop.permute.xlu1 %888 }
 0x29f   : > { %v893_v4 = vmax.f32 %v883_v0, %v889_v3 }
 0x2a1   : > { %896 = vst.msk [vmem:[#allocation2 + $0x8] sm:$0xff] %vm894_vm2, %v893_v4  ;;  %1480 = vmatmul.mubr.msk.f32.vlgmr.msra.gmra.mrb[4].mxu1 %vm894_vm2, %v893_v4 }
 0x374   : > { %v1481_v6 = vpop.f32.mrb[4].mxu1 }
 0x375   : > { %v984_v8 = vadd.f32 %v1481_v6, %v1416_v5  ;;  %v978_v9 = vpop.f32.mrb[5].mxu1 }
 0x376   : > { %v979_v11 = vadd.f32 %v1416_v5, %v978_v9 }
 0x377   : > { %v990_v12 = vadd.f32 %v988_v7, %v984_v8 }
 0x378   : > { %v989_v13 = vadd.f32 %v987_v10, %v979_v11 }
 0x379   : > { %993 = vadd.xlane.f32.xlu1 %v990_v12  ;;  %v999_v15 = vmul.f32 %v990_v12, %v990_v12 }
 0x37a   : > { %991 = vadd.xlane.f32.xlu0 %v989_v13  ;;  %v998_v14 = vmul.f32 %v989_v13, %v989_v13 }
 0x37e   : > { %1000 = vadd.xlane.f32.xlu0 %v998_v14 }
 0x382   : > { %1002 = vadd.xlane.f32.xlu0 %v999_v15 }
 0x406   : > { %v994_v18 = vpop.xlane.xlu1 %993 }
 0x407   : > { %v992_v16 = vpop.xlane.xlu0 %991  ;;  %v997_v20 = vmul.f32 0.0078125, %v994_v18 }
 0x408   : > { %v996_v17 = vmul.f32 0.0078125, %v992_v16 }
 0x409   : > { %v1007_v25 = vmul.f32 %v997_v20, %v997_v20  ;;  %v1011_v35 = vsub.f32 %v990_v12, %v997_v20 }
 0x40a   : > { %v1006_v21 = vmul.f32 %v996_v17, %v996_v17  ;;  %v1010_v30 = vsub.f32 %v989_v13, %v996_v17 }
 0x40b   : > { %v1001_v19 = vpop.xlane.xlu0 %1000 }
 0x40c   : > { %v1004_v22 = vmul.f32 0.0078125, %v1001_v19 }
 0x40e   : > { %v1008_v23 = vsub.f32 %v1004_v22, %v1006_v21 }
 0x40f   : > { %v1003_v24 = vpop.xlane.xlu0 %1002 }
 0x410   : > { %v1012_v26 = vadd.f32 1e-12, %v1008_v23  ;;  %v1005_v27 = vmul.f32 0.0078125, %v1003_v24 }
 0x412   : > { %1641 = vrsqrt.f32 %v1012_v26  ;;  %v1009_v28 = vsub.f32 %v1005_v27, %v1007_v25 }
 0x414   : > { %v1013_v29 = vadd.f32 1e-12, %v1009_v28 }
 0x416   : > { %1643 = vrsqrt.f32 %v1013_v29 }
 0x41c   : > { %v1642_v31 = vpop.eup %1641 }
 0x41d   : > { %v1016_v33 = vmul.f32 %v1642_v31, %v1010_v30 }
 0x41f   : > { %v1025_v36 = vmul.f32 %v1419_v32, %v1016_v33 }
 0x420   : > { %v1644_v37 = vpop.eup %1643 }
 0x421   : > { %v1034_v38 = vadd.f32 %v1420_v34, %v1025_v36  ;;  %v1017_v39 = vmul.f32 %v1644_v37, %v1011_v35 }
 0x423   : > { %1036 = vst [vmem:[%s1977_s14] sm:$0xff] %v1034_v38  ;;  %v1026_v40 = vmul.f32 %v1419_v32, %v1017_v39 }
 0x425   : > { %v1035_v41 = vadd.f32 %v1420_v34, %v1026_v40 }
 0x427   : > { %1037 = vst [vmem:[%s1977_s14 + $0x8] sm:$0xff] %v1035_v41 }
 0x428 PF: > { %v1047_v42 = vld [vmem:[%s456_s7] sm:$0xff]  ;;  %v1048_v43 = vld [vmem:[%s456_s7 + $0x8] sm:$0xff]  ;;  %vm1056_vm3 = vcmask 130048   ;;  %v1776_v47 = vmov 0   ;;  %vm1178_vm4 = vcmask 7168   ;;  %v1183_v57 = vlaneseq  ;;  %s1424_s7 = sshll.u32 %s1753_s26, 7 }
 0x429   : > { %v1045_v44 = vld [vmem:[#allocation2] sm:$0xff]  ;;  %v1541_v45 = vpack.c.bf16 %v1048_v43, %v1047_v42  ;;  %v1046_v46 = vld [vmem:[#allocation2 + $0x8] sm:$0xff]  ;;  %1646 = vset.pattern.permute.xlu0 %v1776_v47  ;;  %1645 = vset.pattern.permute.xlu1 %v1776_v47  ;;  %v1186_v63 = vstv %s1424_s7  ;;  %v1777_v4 = vmov 0.0   ;;  %p1427_p6 = scmp.ne.s32.totalorder %s1753_s26, 1 }
 0x42a   : > { %1486 = vmatprep.mubr.msk.f32.mxu0 %vm1056_vm3, %v1045_v44  ;;  %v1421_v48 = vld [vmem:[%s527_s9] ss:$0 sm:$0xff]  ;;  %v1184_v62 = vand.u32 127, %v1183_v57  ;;  %v1189_v1 = vld [vmem:[%s1969_s23 + $0x8] sm:$0xff] }
 0x42b   : > { %1542 = vmatprep.subr.bf16.mxu0 %v1541_v45  ;;  %v1188_v53 = vld [vmem:[%s1969_s23] sm:$0xff]  ;;  %v1138_v54 = vld [vmem:[#allocation3] sm:$0xff]  ;;  %v1139_v58 = vld [vmem:[#allocation3 + $0x8] sm:$0xff] }
 0x42c   : > { %1544 = vmatpush3.bf16.msra.mxu0 %v1541_v45  ;;  %v1187_v2 = vadd.s32 %v1186_v63, %v1184_v62  ;;  %v1202_v18 = vld [vmem:[#allocation5] sm:$0xff]  ;;  %v1153_v24 = vld [vmem:[#allocation4 + $0x8] sm:$0xff]  ;;  %v1152_v28 = vld [vmem:[#allocation4] sm:$0xff] }
 0x42d   : > { %v1203_v33 = vld [vmem:[#allocation5 + $0x8] sm:$0xff] }
 0x42f   : > { %1487 = vmatmul.mubr.msk.f32.vlgmr.msra.gmra.mrb[0].mxu0 %vm1056_vm3, %v1046_v46 }
 0x502   : > { %v1488_v49 = vpop.f32.mrb[0].mxu0 }
 0x503   : > { %v1129_v50 = vpop.f32.mrb[1].mxu0  ;;  %v1135_v52 = vadd.f32 %v1488_v49, %v1421_v48 }
 0x504   : > { %v1130_v51 = vadd.f32 %v1421_v48, %v1129_v50 }
 0x506   : > { %1140 = vmax.xlane.f32.xlu0 %v1130_v51 }
 0x50a   : > { %1142 = vmax.xlane.f32.xlu0 %v1135_v52 }
 0x520   : > { %1191 = vperm.xlu0 %1646, %v1188_v53  }
 0x593   : > { %v1141_v55 = vpop.xlane.xlu0 %1140 }
 0x594   : > { %v1144_v56 = vmax.f32 %v1138_v54, %v1141_v55 }
 0x596   : > { %v1146_v59 = vsub.f32 %v1138_v54, %v1144_v56  ;;  %1181 = vst.msk [vmem:[#allocation3] sm:$0xff] %vm1178_vm4, %v1144_v56  ;;  %1158 = vperm.xlu1 %1645, %v1144_v56  }
 0x597   : > { %v1143_v60 = vpop.xlane.xlu0 %1142 }
 0x598   : > { %v1145_v61 = vmax.f32 %v1139_v58, %v1143_v60  ;;  %v1148_v22 = vmul.f32 1.442695, %v1146_v59 }
 0x59a   : > { %v1147_v0 = vsub.f32 %v1139_v58, %v1145_v61  ;;  %1182 = vst.msk [vmem:[#allocation3 + $0x8] sm:$0xff] %vm1178_vm4, %v1145_v61  ;;  %1163 = vperm.xlu1 %1645, %v1145_v61  }
 0x59c   : > { %v1150_v21 = vmul.f32 1.442695, %v1147_v0 }
 0x59d   : > { %v1218_v39 = vld [vmem:[#allocation3] sm:$0xff] (!%p1427_p6) }
 0x59e   : > { %1194 = vperm.xlu1 %1645, %v1189_v1  }
 0x59f   : > { %v1192_v3 = vpop.permute.xlu0 %1191 }
 0x5a0   : > { %vm1196_vm5 = vcmp.eq.s32.totalorder %v1187_v2, %v1192_v3 }
 0x5a1   : > { %v1425_v5 = vsel %vm1196_vm5, 1.0, %v1777_v4  ;;  %v1219_v42 = vld [vmem:[#allocation3 + $0x8] sm:$0xff] (!%p1427_p6) }
 0x5a2   : > { %v1204_v6 = vmul.f32 %v1425_v5, %v1130_v51 }
 0x5a4   : > { %1206 = vadd.xlane.f32.xlu0 %v1204_v6 }
 0x615   : > { %v1159_v7 = vpop.permute.xlu1 %1158 }
 0x616   : > { %v1166_v9 = vsub.f32 %v1130_v51, %v1159_v7 }
 0x618   : > { %v1168_v12 = vmul.f32 1.442695, %v1166_v9 }
 0x619   : > { %v1164_v8 = vpop.permute.xlu1 %1163 }
 0x61a   : > { %v1167_v10 = vsub.f32 %v1135_v52, %v1164_v8 }
 0x61c   : > { %v1170_v11 = vmul.f32 1.442695, %v1167_v10 }
 0x61d   : > { %v1195_v13 = vpop.permute.xlu1 %1194 }
 0x61e   : > { %1647 = vpow2.f32 %v1170_v11  ;;  %vm1197_vm6 = vcmp.eq.s32.totalorder %v1187_v2, %v1195_v13 }
 0x61f   : > { %1649 = vpow2.f32 %v1168_v12  ;;  %v1426_v16 = vsel %vm1197_vm6, 1.0, %v1777_v4 }
 0x620   : > { %v1205_v17 = vmul.f32 %v1426_v16, %v1135_v52  ;;  %1651 = vpow2.f32 %v1150_v21 }
 0x621   : > { %1653 = vpow2.f32 %v1148_v22 }
 0x628   : > { %v1648_v14 = vpop.eup %1647 }
 0x629   : > { %1174 = vadd.xlane.f32.xlu1 %v1648_v14  ;;  %v1650_v15 = vpop.eup %1649 }
 0x62a   : > { %v1652_v23 = vpop.eup %1651 }
 0x62b   : > { %v1155_v25 = vmul.f32 %v1652_v23, %v1153_v24  ;;  %v1654_v26 = vpop.eup %1653 }
 0x62c   : > { %v1154_v30 = vmul.f32 %v1654_v26, %v1152_v28 }
 0x62d   : > { %1172 = vadd.xlane.f32.xlu1 %v1650_v15 }
 0x631   : > { %1208 = vadd.xlane.f32.xlu1 %v1205_v17  ;;  %v1207_v19 = vpop.xlane.xlu0 %1206 }
 0x632   : > { %v1210_v20 = vadd.f32 %v1207_v19, %v1202_v18 }
 0x634   : > { %1212 = vst.msk [vmem:[#allocation5] sm:$0xff] %vm1178_vm4, %v1210_v20 }
 0x63b   : > { %v1228_v43 = vld [vmem:[#allocation5] sm:$0xff] (!%p1427_p6) }
 0x6b6   : > { %v1175_v27 = vpop.xlane.xlu1 %1174 }
 0x6b7   : > { %v1177_v29 = vadd.f32 %v1175_v27, %v1155_v25 }
 0x6b9   : > { %1180 = vst.msk [vmem:[#allocation4 + $0x8] sm:$0xff] %vm1178_vm4, %v1177_v29 }
 0x6ba   : > { %v1173_v31 = vpop.xlane.xlu1 %1172 }
 0x6bb   : > { %v1176_v32 = vadd.f32 %v1173_v31, %v1154_v30  ;;  %1217 = sbr.rel (%p1427_p6) target bundleno = 1752 (0x6d8), region = 110 }
 0x6bd   : > { %1179 = vst.msk [vmem:[#allocation4] sm:$0xff] %vm1178_vm4, %v1176_v32 }
 0x6be   : > { %v1209_v34 = vpop.xlane.xlu1 %1208 }
 0x6bf   : > { %v1211_v35 = vadd.f32 %v1209_v34, %v1203_v33 }
 0x6c0   : > { %v1221_v37 = vld [vmem:[#allocation4 + $0x8] sm:$0xff] (!%p1427_p6) }
 0x6c1   : > { %1213 = vst.msk [vmem:[#allocation5 + $0x8] sm:$0xff] %vm1178_vm4, %v1211_v35 }
 0x6c4   : > { %v1220_v36 = vld [vmem:[#allocation4] sm:$0xff] }
 0x6c5   : > { %1655 = vlog2.f32 %v1220_v36 }
 0x6c6   : > { %1657 = vlog2.f32 %v1221_v37 }
 0x6c8   : > { %v1229_v46 = vld [vmem:[#allocation5 + $0x8] sm:$0xff] }
 0x6cf   : > { %v1656_v38 = vpop.eup %1655 }
 0x6d0   : > { %v1658_v40 = vpop.eup %1657  ;;  %v1223_v41 = vmul.f32 0.6931472, %v1656_v38 }
 0x6d1   : > { %v1225_v44 = vmul.f32 0.6931472, %v1658_v40 }
 0x6d2   : > { %v1226_v45 = vadd.f32 %v1223_v41, %v1218_v39 }
 0x6d3   : > { %v1227_v47 = vadd.f32 %v1225_v44, %v1219_v42 }
 0x6d4   : > { %v1230_v48 = vsub.f32 %v1226_v45, %v1228_v43 }
 0x6d5   : > { %v1231_v49 = vsub.f32 %v1227_v47, %v1229_v46 }
 0x6d6   : > { %1232 = vst.msk [vmem:[%s1974_s30] sm:$0xff] %vm1178_vm4, %v1230_v48 }
 0x6d7   : > { %1233 = vst.msk [vmem:[%s1974_s30 + $0x8] sm:$0xff] %vm1178_vm4, %v1231_v49 }
 0x6d8 PF: > { %s1433_s23 = sshll.u32 %s1757_s27, 8  ;;  %s2283_s17 = sld [smem:[#allocation25_spill]] }
 0x6d9   : > { %s1253_s28 = sshll.u32 %s1977_s14, 4  ;;  %s2284_s20 = sand.u32 1, %s1737_s22   ;;  %s2171_s28 = int_to_ptr.vmem [resolvable:$true] %s1253_s28 }
 0x6da   : > { %s2175_s15 = scalar_lea.sflag [#allocation8], %s2284_s20  ;;  %s1659_s30 = scalar_lea.vmem %s2171_s28, 256 }
 0x6db   : > { %p1660_p7 = scmp.ne.s32.totalorder %s2171_s28, %s1659_s30  ;;  %s1778_s27 = smov [#allocation7]  }
 0x6dc   : > { %s1663_s16 = sshll.u32 %s1778_s27, 4  ;;  %s1664_s16 = int_to_ptr.vmem [resolvable:$false] %s1663_s16 }
 0x6dd   : > { %p1661_p8 = pnand %p1660_p7, %p1925_p10  ;;  %s1665_s29 = scalar_lea.vmem %s1664_s16, 512 }
 0x6de   : > { %s2168_s25 = scalar_lea.hbm %s2283_s17, %s1433_s23  ;;  %p1666_p11 = scmp.lt.s32.totalorder %s2171_s28, %s1664_s16 }
 0x6df   : > { %p1662_p9 = pneg %p1661_p8  ;;  %p1667_p13 = scmp.lt.s32.totalorder %s1665_s29, %s1659_s30 }
 0x6e1   : > { %p1668_p0 = por %p1667_p13, %p1666_p11 }
 0x6e3   : > { %p1669_p1 = pnand %p1668_p0, %p1662_p9 }
 0x6e5   : > { %1672 = shalt.err (!%p1669_p1)
}
 0x6e6   : > { %s1673_s14 = scalar_lea.hbm %s2168_s25, 256  ;;  %s1677_s18 = scalar_lea.hbm %s2283_s17, 512 }
 0x6e7   : > { %p1674_p2 = scmp.ne.s32.totalorder %s2168_s25, %s1673_s14  ;;  %p1678_p5 = scmp.lt.u32.totalorder %s2168_s25, %s2283_s17 }
 0x6e8   : > { %p1679_p6 = scmp.lt.u32.totalorder %s1677_s18, %s1673_s14  ;;  %p1681_p8 = scmp.lt.u32.totalorder %s1673_s14, %s2168_s25 }
 0x6e9   : > { %p1675_p3 = pnand %p1674_p2, %p1925_p10 }
 0x6ea   : > { %p1680_p7 = por %p1679_p6, %p1678_p5 }
 0x6eb   : > { %p1676_p4 = pneg %p1675_p3 }
 0x6ec   : > { %p1682_p9 = por %p1681_p8, %p1680_p7 }
 0x6ee   : > { %p1683_p11 = pnand %p1682_p9, %p1676_p4 }
 0x6f0   : > { %1686 = shalt.err (!%p1683_p11)
}
 0x6f1   : > { %s1779_s13 = smov 128   ;;  %s1780_s7 = smov 8  }
 0x6f2   : > { %1545 = dma.vmem_to_hbm [thread:$0]  (%p1925_p10), %s2171_s28, 256, %s2168_s25, %s2175_s15, %s1779_s13, %s1779_s13, %s1780_s7  }
 0x6f3 PF: > { %s2285_s23 = sld [smem:[#allocation15_spill]]  ;;  %s2286_s26 = sld [smem:[#allocation10_spill]] }
 0x6f9   : > { %p1551_p13 = scmp.ge.s32.totalorder %s2285_s23, 2  ;;  %s1272_s20 = sand.u32 1, %s2286_s26  }
 0x6fa   : > { %s1273_s30 = scalar_lea.sflag [#allocation8], %s1272_s20 }
 0x6fb   : > { %p1548_p0 = pnand %p1551_p13, %p1932_p12 }
 0x6fd   : > { %1728 = dma.done.wait (!%p1548_p0), %s1273_s30, 256  }
 0x6fe   : > { %1730 = vsyncadd (!%p1548_p0), %s1273_s30, 4294967040  ;;  %s26_s30 = sadd.s32 1, %s2285_s23   ;;  %s2288_s27 = sld [smem:[#allocation11_spill]] }
 0x6ff   : > { %p23_p1 = scmp.ge.s32.totalorder %s26_s30, 6   ;;  %s2289_s23 = sld [smem:[#allocation20_spill]] }
 0x700   : > { %s2290_s24 = sld [smem:[#allocation12_spill]]  ;;  %s2291_s25 = sld [smem:[#allocation18_spill]] }
 0x701   : > { %s2292_s26 = sld [smem:[#allocation13_spill]]  ;;  %s2293_s9 = sld [smem:[#allocation14_spill]] }
 0x702   : > { %s2294_s28 = sld [smem:[#allocation16_spill]]  ;;  %s2295_s29 = sld [smem:[#allocation17_spill]] }
 0x703   : > { %s2296_s21 = smov %s1737_s22  ;;  %25 = sbr.rel (!%p23_p1) target bundleno = 11 (0xb), region = 171 }
 0x704   : > { %s2297_s22 = smov %s2288_s27 }
 0x707   : > { %s2298_s27 = smov %s2293_s9 }
 0x70a   :  { %1286 = vsyncpa [#allocation8], 1 }
 0x70b   :  { %1288 = vsyncpa [#allocation8 + $0x1], 1 }

</bundles_post_ra>
